<compile_context>
chip_gen: v6e
topology: v6e:2x2x1
jax: 0.10.0
libtpu: 0.0.40
codegen_flags: <defaults>
</compile_context>

<pallas_src>
import jax
import jax.numpy as jnp
from jax.experimental import pallas as pl
from jax.experimental.pallas import tpu as pltpu

DIM = 3                           # Material.dim
GROUP = DIM * DIM                 # 9 contiguous elements per row-major matrix
MATS_PER_ROW = 128                # matrices packed along the lane axis per row
ROW_LANES = GROUP * MATS_PER_ROW  # 1152 = 9 * 128  (multiple of 128)

# nn.Parameter(torch.Tensor([1.0])) -- never used by any computation.
USELESS_PARAM = jnp.array([1.0], dtype=jnp.float32)

# TODO(synk): Material.svd = SVD() (iterative 3x3 SVD submodule) is never
# invoked by this abstract class and is not implemented here.


def _transpose_kernel(f_ref, o_ref):
    """f_ref / o_ref: (TB, ROW_LANES); each row holds 128 row-major 3x3
    matrices.  out[:, p] = x[:, p + 2*(j - i)] with p = 9*m + 3*i + j."""
    x = f_ref[...]

    # Per-lane position inside its 3x3 matrix, computed on a single (1, 1152)
    # row (the mod-9 integer work is done once per row-position, not per
    # sublane); jnp.where broadcasts it over the TB sublanes for free-ish.
    k = jax.lax.broadcasted_iota(jnp.int32, (1, ROW_LANES), 1) % GROUP

    # Required source offset d = 2*(j - i):
    #   d = +2 at k in {1, 5}; +4 at {2}; -2 at {3, 7}; -4 at {6}; 0 elsewhere.
    shift_masks = (
        (2, (k == 1) | (k == 5)),
        (4, (k == 2)),
        (-2, (k == 3) | (k == 7)),
        (-4, (k == 6)),
    )

    out = x                       # d == 0: diagonal elements stay in place
    for s, m in shift_masks:
        # Cyclic roll: rolled[:, p] == x[:, (p + s) % ROW_LANES].  Lanes whose
        # source would wrap across the row boundary never have m True (the
        # source always stays inside the same 9-lane group), so wrap-around
        # values are never selected.
        rolled = pltpu.roll(x, (-s) % ROW_LANES, 1)
        out = jnp.where(m, rolled, out)
    o_ref[...] = out


def _sublane_pack(dtype) -> int:
    # Rows per packed sublane tile: f32 -> 8, bf16 -> 16, int8/fp8 -> 32.
    return max(8, 32 // jnp.dtype(dtype).itemsize)


def _choose_block_rows(rows: int, block_rows: int, dtype) -> int:
    """Pick the per-step row-block: split into >= 2 grid steps (so the single
    "parallel" axis can shard across v7x's two TensorCores), then make each
    block as large as possible (<= block_rows) and sublane-pack aligned."""
    pack = _sublane_pack(dtype)
    if rows <= pack:
        return rows               # single full-extent block (always legal)
    half = -(-rows // 2)          # ceil(rows / 2)
    tb = min(block_rows, half)
    tb = max(pack, (tb // pack) * pack)
    return min(tb, rows)


def _pick_vmem_limit() -> int:
    """64 MiB on 128-MiB-VMEM chips (v5e/v6e); ~48 MiB on v7x (64 MiB VMEM)."""
    try:
        cap = getattr(pltpu.get_tpu_info(), "vmem_capacity_bytes", None)
        if cap:
            return min(64 * 1024 * 1024,
                       max(cap - 16 * 1024 * 1024, 32 * 1024 * 1024))
    except Exception:
        pass
    return 48 * 1024 * 1024       # safe on every current generation


def material_transpose(F: jax.Array, *, block_rows: int = 1024) -> jax.Array:
    """Pallas equivalent of Material.transpose: (N, 3, 3) -> F.permute(0, 2, 1).

    Prefer folding the (j, i) swap into the consumer kernel's index_map /
    in-kernel indexing instead of calling this (zero extra HBM traffic)."""
    N = F.shape[0]
    assert F.shape[1:] == (DIM, DIM), f"expected (N, {DIM}, {DIM}), got {F.shape}"
    if N == 0:
        return F

    n_main = (N // MATS_PER_ROW) * MATS_PER_ROW
    if n_main == 0:
        # Fewer than 128 matrices: a kernel launch cannot beat plain XLA here.
        return jnp.transpose(F, (0, 2, 1))

    main = F if n_main == N else F[:n_main]
    rows = n_main // MATS_PER_ROW
    x = main.reshape(rows, ROW_LANES)       # lane-dense 2-D view (free reshape)

    tb = _choose_block_rows(rows, block_rows, F.dtype)
    grid = (pl.cdiv(rows, tb),)             # partial last block handled by Pallas

    out = pl.pallas_call(
        _transpose_kernel,
        out_shape=jax.ShapeDtypeStruct((rows, ROW_LANES), F.dtype),
        grid_spec=pl.GridSpec(
            grid=grid,
            in_specs=[pl.BlockSpec((tb, ROW_LANES), lambda r: (r, 0))],
            out_specs=pl.BlockSpec((tb, ROW_LANES), lambda r: (r, 0)),
        ),
        compiler_params=pltpu.CompilerParams(
            # Single "parallel" axis -> shardable across v7x's 2 TensorCores.
            dimension_semantics=("parallel",),
            vmem_limit_bytes=_pick_vmem_limit(),
        ),
    )(x)

    out = out.reshape(n_main, DIM, DIM)
    if n_main != N:
        # < 128-matrix tail: tiny, handled by XLA (no full-array pad/unpad).
        tail = jnp.transpose(F[n_main:], (0, 2, 1))
        out = jnp.concatenate([out, tail], axis=0)
    return out


def material_forward(F, log_E=None, nu=None):
    # Material.forward is abstract in the reference module.
    # TODO(synk): concrete constitutive models (subclasses) implement this.
    raise NotImplementedError


if __name__ == "__main__":
    key = jax.random.PRNGKey(0)

    # Small deterministic batches of 3x3 deformation gradients.
    cases = [
        (512, {}),                      # multiple of 128, rows=4, single block
        (2560, {}),                     # rows=20 -> grid split across >= 2 steps
        (1000, {}),                     # ragged: 896 via kernel + 104-matrix tail
        (50, {}),                       # < 128 matrices: pure XLA path
        (2560, {"block_rows": 8}),      # forced small blocks / multi-step grid
    ]
    for n, kwargs in cases:
        key, sub = jax.random.split(key)
        F = jax.random.normal(sub, (n, DIM, DIM), dtype=jnp.float32)
        out = jax.block_until_ready(material_transpose(F, **kwargs))
        ref = jnp.transpose(F, (0, 2, 1))
        assert out.shape == (n, DIM, DIM) and out.dtype == F.dtype
        assert jnp.array_equal(out, ref), f"Pallas transpose mismatch for N={n}"

    print("KERNEL_OK")
</pallas_src>

<mosaic_0001>
module attributes {stable_mosaic.version = 11 : i64} {
  func.func @_transpose_kernel(%arg0: i32, %arg1: memref<4x1152xf32, #tpu.memory_space<vmem>>, %arg2: memref<4x1152xf32, #tpu.memory_space<vmem>>) attributes {dimension_semantics = [#tpu.dimension_semantics<parallel>], iteration_bounds = array<i64: 1>, scalar_prefetch = 0 : i64, scratch_operands = 0 : i64, tpu.core_type = #tpu.core_type<tc>, window_params = [{transform_indices = @transform_0, window_bounds = array<i64: 4, 1152>}, {transform_indices = @transform_1, window_bounds = array<i64: 4, 1152>}]} {
    %c0 = arith.constant 0 : index
    %c0_0 = arith.constant 0 : index
    %0 = vector.load %arg1[%c0, %c0_0] : memref<4x1152xf32, #tpu.memory_space<vmem>>, vector<4x1152xf32>
    %1 = tpu.iota {dimensions = array<i32: 1>} : vector<1x1152xi32>
    %c9_i32 = arith.constant 9 : i32
    %c0_i32 = arith.constant 0 : i32
    %2 = arith.cmpi eq, %c9_i32, %c0_i32 : i32
    %c1_i32 = arith.constant 1 : i32
    %3 = arith.select %2, %c1_i32, %c9_i32 : i32
    %4 = vector.broadcast %3 : i32 to vector<1x1152xi32>
    %5 = arith.remsi %1, %4 : vector<1x1152xi32>
    %c0_i32_1 = arith.constant 0 : i32
    %6 = vector.broadcast %c0_i32_1 : i32 to vector<1x1152xi32>
    %7 = arith.cmpi ne, %5, %6 : vector<1x1152xi32>
    %c0_i32_2 = arith.constant 0 : i32
    %8 = vector.broadcast %c0_i32_2 : i32 to vector<1x1152xi32>
    %9 = arith.cmpi slt, %5, %8 : vector<1x1152xi32>
    %c0_i32_3 = arith.constant 0 : i32
    %10 = arith.cmpi slt, %3, %c0_i32_3 : i32
    %11 = vector.broadcast %10 : i1 to vector<1x1152xi1>
    %12 = vector.broadcast %11 : vector<1x1152xi1> to vector<1x1152xi1>
    %13 = arith.xori %9, %12 : vector<1x1152xi1>
    %14 = arith.andi %13, %7 : vector<1x1152xi1>
    %15 = vector.broadcast %3 : i32 to vector<1x1152xi32>
    %16 = arith.addi %5, %15 : vector<1x1152xi32>
    %17 = arith.select %14, %16, %5 : vector<1x1152xi1>, vector<1x1152xi32>
    %c1_i32_4 = arith.constant 1 : i32
    %18 = vector.broadcast %c1_i32_4 : i32 to vector<1x1152xi32>
    %19 = arith.cmpi eq, %17, %18 : vector<1x1152xi32>
    %c5_i32 = arith.constant 5 : i32
    %20 = vector.broadcast %c5_i32 : i32 to vector<1x1152xi32>
    %21 = arith.cmpi eq, %17, %20 : vector<1x1152xi32>
    %22 = arith.ori %19, %21 : vector<1x1152xi1>
    %c2_i32 = arith.constant 2 : i32
    %23 = vector.broadcast %c2_i32 : i32 to vector<1x1152xi32>
    %24 = arith.cmpi eq, %17, %23 : vector<1x1152xi32>
    %c3_i32 = arith.constant 3 : i32
    %25 = vector.broadcast %c3_i32 : i32 to vector<1x1152xi32>
    %26 = arith.cmpi eq, %17, %25 : vector<1x1152xi32>
    %c7_i32 = arith.constant 7 : i32
    %27 = vector.broadcast %c7_i32 : i32 to vector<1x1152xi32>
    %28 = arith.cmpi eq, %17, %27 : vector<1x1152xi32>
    %29 = arith.ori %26, %28 : vector<1x1152xi1>
    %c6_i32 = arith.constant 6 : i32
    %30 = vector.broadcast %c6_i32 : i32 to vector<1x1152xi32>
    %31 = arith.cmpi eq, %17, %30 : vector<1x1152xi32>
    %c1150_i32 = arith.constant 1150 : i32
    %32 = tpu.dynamic_rotate %0 by %c1150_i32 dim 1 : vector<4x1152xf32>, i32 -> vector<4x1152xf32>
    %33 = vector.shape_cast %22 : vector<1x1152xi1> to vector<1x1152xi1>
    %34 = vector.broadcast %33 : vector<1x1152xi1> to vector<4x1152xi1>
    %35 = arith.select %34, %32, %0 : vector<4x1152xi1>, vector<4x1152xf32>
    %c1148_i32 = arith.constant 1148 : i32
    %36 = tpu.dynamic_rotate %0 by %c1148_i32 dim 1 : vector<4x1152xf32>, i32 -> vector<4x1152xf32>
    %37 = vector.shape_cast %24 : vector<1x1152xi1> to vector<1x1152xi1>
    %38 = vector.broadcast %37 : vector<1x1152xi1> to vector<4x1152xi1>
    %39 = arith.select %38, %36, %35 : vector<4x1152xi1>, vector<4x1152xf32>
    %c2_i32_5 = arith.constant 2 : i32
    %40 = tpu.dynamic_rotate %0 by %c2_i32_5 dim 1 : vector<4x1152xf32>, i32 -> vector<4x1152xf32>
    %41 = vector.shape_cast %29 : vector<1x1152xi1> to vector<1x1152xi1>
    %42 = vector.broadcast %41 : vector<1x1152xi1> to vector<4x1152xi1>
    %43 = arith.select %42, %40, %39 : vector<4x1152xi1>, vector<4x1152xf32>
    %c4_i32 = arith.constant 4 : i32
    %44 = tpu.dynamic_rotate %0 by %c4_i32 dim 1 : vector<4x1152xf32>, i32 -> vector<4x1152xf32>
    %45 = vector.shape_cast %31 : vector<1x1152xi1> to vector<1x1152xi1>
    %46 = vector.broadcast %45 : vector<1x1152xi1> to vector<4x1152xi1>
    %47 = arith.select %46, %44, %43 : vector<4x1152xi1>, vector<4x1152xf32>
    %c0_6 = arith.constant 0 : index
    %c0_7 = arith.constant 0 : index
    %48 = vector.load %arg2[%c0_6, %c0_7] : memref<4x1152xf32, #tpu.memory_space<vmem>>, vector<4x1152xf32>
    tpu.vector_store %arg2[%c0_6, %c0_7], %47 {strides = array<i32>} : memref<4x1152xf32, #tpu.memory_space<vmem>>, vector<4x1152xf32>,
    return
  }
  func.func @transform_0(%arg0: i32) -> (i32, i32) {
    %c0_i32 = arith.constant 0 : i32
    %c0_i32_0 = arith.constant 0 : i32
    return %arg0, %c0_i32 : i32, i32
  }
  func.func @transform_1(%arg0: i32) -> (i32, i32) {
    %c0_i32 = arith.constant 0 : i32
    %c0_i32_0 = arith.constant 0 : i32
    return %arg0, %c0_i32 : i32, i32
  }
}

</mosaic_0001>

<bundles_post_ra>
// kernel: tpu_custom_call.1
= control target key start
LH: loop header
LB: loop body
LE: loop exit
PB: predicated region body
PF: predicated region fallthrough
CT: control target
= control target key end

     0   :  { %6 = vsyncpa [#allocation3], 0  ;;  %s1280_s0 = inlined_call_operand.hbm [shape: f32[4,1152], index: 0, kind: input, shape index: {}]   ;;  %s1281_s1 = inlined_call_operand.hbm [shape: f32[4,1152], index: 1, kind: output, shape index: {}]  }
   0x1   :  { %7 = vsyncpa [#allocation4], 0  ;;  %s592_s6 = smov [#allocation2]  }
   0x2   :  { %s14_s7 = sshll.u32 %s592_s6, 4  ;;  %s15_s7 = int_to_ptr.vmem [resolvable:$true] %s14_s7 }
   0x3   :  { %s556_s8 = scalar_lea.vmem %s15_s7, 576  ;;  %p561_p1 = scmp.lt.s32.totalorder %s15_s7, %s15_s7 }
   0x4   :  { %p557_p0 = scmp.ne.s32.totalorder %s15_s7, %s556_s8  ;;  %p562_p2 = scmp.lt.s32.totalorder %s556_s8, %s556_s8 }
   0x6   :  { %p563_p3 = por %p562_p2, %p561_p1 }
   0x8   :  { %p564_p4 = pnand %p563_p3, %p557_p0 }
   0xa   :  { %567 = shalt.err (!%p564_p4)
}
   0xb   :  { %17 = dma.hbm_to_vmem [thread:$0]  %s1280_s0, 576, %s15_s7, [#allocation3]  }
   0xc   :  { %588 = dma.done.wait [#allocation3], 576  }
   0xd   :  { %589 = vsyncadd [#allocation3], 4294966720  ;;  %v611_v0 = vld [vmem:[#allocation2 + $0x8] sm:$0xff]  ;;  %v613_v1 = vld [vmem:[#allocation2] sm:$0xff]  ;;  %s593_s11 = smov 126   ;;  %s594_s0 = smov 124   ;;  %v26_v11 = vlaneseq }
   0xe   :  { %268 = vrot.lane.b32.xlu1 %v611_v0, %s593_s11  ;;  %264 = vrot.lane.b32.xlu0 %v613_v1, %s593_s11  ;;  %v619_v2 = vcombine.high %v611_v0, %v611_v0  ;;  %v621_v3 = vld [vmem:[#allocation2 + $0x10] sm:$0xff]  ;;  %v631_v5 = vcombine.high %v613_v1, %v613_v1  ;;  %v633_v6 = vld [vmem:[#allocation2 + $0x18] sm:$0xff]  ;;  %v643_v8 = vld [vmem:[#allocation2 + $0x20] sm:$0xf]  ;;  %s595_s12 = smov 2   ;;  %s596_s13 = smov 4  }
   0xf   :  { %v627_v4 = vcombine.high %v621_v3, %v621_v3  ;;  %v639_v7 = vcombine.high %v633_v6, %v633_v6  ;;  %v681_v14 = vand.u32 127, %v26_v11  ;;  %s597_s14 = smov [#allocation5]  }
  0x10   :  { %s511_s15 = sshll.u32 %s597_s14, 4  ;;  %s512_s15 = int_to_ptr.vmem [resolvable:$true] %s511_s15 }
  0x11   :  { %v29_v17 = vadd.s32 256, %v681_v14  ;;  %v30_v18 = vadd.s32 384, %v681_v14  ;;  %v31_v19 = vadd.s32 512, %v681_v14  ;;  %v28_v20 = vadd.s32 128, %v681_v14  ;;  %s568_s16 = scalar_lea.vmem %s512_s15, 576  ;;  %p573_p6 = scmp.lt.s32.totalorder %s512_s15, %s512_s15 }
  0x12   :  { %270 = vrot.lane.b32.xlu1 %v619_v2, %s593_s11  ;;  %272 = vrot.lane.b32.xlu0 %v621_v3, %s593_s11  ;;  %v692_v21 = vmul.u32.u64.low 3817748708, %v681_v14  ;;  %v693_v22 = vmul.u32.u64.high 3817748708, %v681_v14, %v692_v21  ;;  %v32_v27 = vadd.s32 640, %v681_v14  ;;  %v33_v30 = vadd.s32 768, %v681_v14  ;;  %p569_p5 = scmp.ne.s32.totalorder %s512_s15, %s568_s16  ;;  %p574_p7 = scmp.lt.s32.totalorder %s568_s16, %s568_s16 }
  0x13   :  { %v699_v25 = vmul.u32.u64.low 3817748708, %v29_v17  ;;  %v700_v26 = vmul.u32.u64.high 3817748708, %v29_v17, %v699_v25  ;;  %v703_v28 = vmul.u32.u64.low 3817748708, %v30_v18  ;;  %v704_v29 = vmul.u32.u64.high 3817748708, %v30_v18, %v703_v28 }
  0x14   :  { %v707_v31 = vmul.u32.u64.low 3817748708, %v31_v19  ;;  %v708_v32 = vmul.u32.u64.high 3817748708, %v31_v19, %v707_v31  ;;  %v710_v33 = vmul.u32.u64.low 3817748708, %v28_v20  ;;  %v711_v34 = vmul.u32.u64.high 3817748708, %v28_v20, %v710_v33  ;;  %p575_p8 = por %p574_p7, %p573_p6 }
  0x15   :  { %v34_v36 = vadd.s32 896, %v681_v14  ;;  %v718_v38 = vmul.u32.u64.low 3817748708, %v32_v27  ;;  %v719_v39 = vmul.u32.u64.high 3817748708, %v32_v27, %v718_v38  ;;  %v722_v40 = vadd.s32 1024, %v681_v14 }
  0x16   :  { %274 = vrot.lane.b32.xlu1 %v627_v4, %s593_s11  ;;  %266 = vrot.lane.b32.xlu0 %v631_v5, %s593_s11  ;;  %v724_v41 = vmul.u32.u64.low 3817748708, %v33_v30  ;;  %v725_v42 = vmul.u32.u64.high 3817748708, %v33_v30, %v724_v41  ;;  %v42_v43 = vshrl.u32 %v693_v22, 3  ;;  %v64_v48 = vshrl.u32 %v700_v26, 3  ;;  %p576_p9 = pnand %p575_p8, %p569_p5 }
  0x17   :  { %v728_v44 = vmul.u32.u64.low 3817748708, %v34_v36  ;;  %v729_v45 = vmul.u32.u64.high 3817748708, %v34_v36, %v728_v44  ;;  %v737_v49 = vmul.u32.u64.low 3817748708, %v722_v40  ;;  %v738_v50 = vmul.u32.u64.high 3817748708, %v722_v40, %v737_v49 }
  0x18   :  { %v75_v51 = vshrl.u32 %v704_v29, 3  ;;  %v86_v52 = vshrl.u32 %v708_v32, 3  ;;  %v43_v53 = vmul.u32 9, %v42_v43  ;;  %v53_v54 = vshrl.u32 %v711_v34, 3 }
  0x19   :  { %v65_v57 = vmul.u32 9, %v64_v48  ;;  %v97_v58 = vshrl.u32 %v719_v39, 3  ;;  %v108_v60 = vshrl.u32 %v725_v42, 3  ;;  %v119_v11 = vshrl.u32 %v729_v45, 3 }
  0x1a   :  { %278 = vrot.lane.b32.xlu1 %v639_v7, %s593_s11  ;;  %276 = vrot.lane.b32.xlu0 %v633_v6, %s593_s11  ;;  %v76_v59 = vmul.u32 9, %v75_v51  ;;  %v87_v61 = vmul.u32 9, %v86_v52  ;;  %v44_v62 = vsub.s32 %v681_v14, %v43_v53  ;;  %v130_v28 = vshrl.u32 %v738_v50, 3 }
  0x1b   :  { %v54_v63 = vmul.u32 9, %v53_v54  ;;  %v66_v25 = vsub.s32 %v29_v17, %v65_v57  ;;  %v98_v26 = vmul.u32 9, %v97_v58 }
  0x1c   :  { %v77_v29 = vsub.s32 %v30_v18, %v76_v59  ;;  %v109_v31 = vmul.u32 9, %v108_v60  ;;  %v88_v32 = vsub.s32 %v31_v19, %v87_v61  ;;  %vm135_vm0 = vcmp.ne.s32.totalorder %v44_v62, 0 }
  0x1d   :  { %v55_v33 = vsub.s32 %v28_v20, %v54_v63  ;;  %vm144_vm1 = vcmp.lt.s32.totalorder %v44_v62, 0  ;;  %v120_v34 = vmul.u32 9, %v119_v11  ;;  %vm137_vm2 = vcmp.ne.s32.totalorder %v66_v25, 0 }
  0x1e   :  { %319 = vrot.lane.b32.xlu1 %v613_v1, %s594_s0  ;;  %280 = vrot.lane.b32.xlu0 %v643_v8, %s593_s11  ;;  %vm146_vm3 = vcmp.lt.s32.totalorder %v66_v25, 0  ;;  %v99_v41 = vsub.s32 %v32_v27, %v98_v26  ;;  %v131_v42 = vmul.u32 9, %v130_v28  ;;  %vm138_vm4 = vcmp.ne.s32.totalorder %v77_v29, 0  ;;  %vm760_vm8 = vmand %vm144_vm1, %vm135_vm0 }
  0x1f   :  { %vm147_vm5 = vcmp.lt.s32.totalorder %v77_v29, 0  ;;  %v110_v17 = vsub.s32 %v33_v30, %v109_v31  ;;  %vm139_vm6 = vcmp.ne.s32.totalorder %v88_v32, 0  ;;  %vm148_vm7 = vcmp.lt.s32.totalorder %v88_v32, 0  ;;  %vm764_vm9 = vmand %vm146_vm3, %vm137_vm2 }
  0x20   :  { %v164_v20 = vadd.s32 9, %v66_v25  ;;  %vm136_vm10 = vcmp.ne.s32.totalorder %v55_v33, 0  ;;  %vm145_vm11 = vcmp.lt.s32.totalorder %v55_v33, 0  ;;  %v121_v43 = vsub.s32 %v34_v36, %v120_v34  ;;  %vm772_vm12 = vmand %vm147_vm5, %vm138_vm4 }
  0x21   :  { %v165_v45 = vadd.s32 9, %v77_v29  ;;  %vm140_vm13 = vcmp.ne.s32.totalorder %v99_v41, 0  ;;  %vm149_vm14 = vcmp.lt.s32.totalorder %v99_v41, 0  ;;  %v132_v48 = vsub.s32 %v722_v40, %v131_v42  ;;  %vm778_vm15 = vmand %vm148_vm7, %vm139_vm6 }
  0x22   :  { %323 = vrot.lane.b32.xlu1 %v611_v0, %s594_s0  ;;  %321 = vrot.lane.b32.xlu0 %v631_v5, %s594_s0  ;;  %v166_v50 = vadd.s32 9, %v88_v32  ;;  %v162_v36 = vadd.s32 9, %v44_v62  ;;  %vm141_vm0 = vcmp.ne.s32.totalorder %v110_v17, 0  ;;  %vm150_vm1 = vcmp.lt.s32.totalorder %v110_v17, 0  ;;  %vm783_vm2 = vmand %vm145_vm11, %vm136_vm10 }
  0x23   :  { %v163_v52 = vadd.s32 9, %v55_v33  ;;  %v167_v53 = vadd.s32 9, %v99_v41  ;;  %v789_v54 = vsel %vm764_vm9, %v164_v20, %v66_v25  ;;  %vm791_vm3 = vmand %vm149_vm14, %vm140_vm13  ;;  %v168_v57 = vadd.s32 9, %v110_v17 }
  0x24   :  { %vm142_vm4 = vcmp.ne.s32.totalorder %v121_v43, 0  ;;  %vm151_vm5 = vcmp.lt.s32.totalorder %v121_v43, 0  ;;  %v801_v60 = vsel %vm772_vm12, %v165_v45, %v77_v29  ;;  %vm159_vm6 = vmand %vm150_vm1, %vm141_vm0  ;;  %vm143_vm7 = vcmp.ne.s32.totalorder %v132_v48, 0 }
  0x25   :  { %vm152_vm10 = vcmp.lt.s32.totalorder %v132_v48, 0  ;;  %v806_v61 = vsel %vm778_vm15, %v166_v50, %v88_v32  ;;  %v810_v63 = vsel %vm760_vm8, %v162_v36, %v44_v62  ;;  %v169_v11 = vadd.s32 9, %v121_v43  ;;  %vm822_vm12 = vmand %vm151_vm5, %vm142_vm4 }
  0x26   :  { %327 = vrot.lane.b32.xlu1 %v621_v3, %s594_s0  ;;  %325 = vrot.lane.b32.xlu0 %v619_v2, %s594_s0  ;;  %vm182_vm11 = vcmp.eq.s32.totalorder %v789_v54, 1  ;;  %v815_v25 = vsel %vm783_vm2, %v163_v52, %v55_v33  ;;  %v819_v26 = vsel %vm791_vm3, %v167_v53, %v99_v41  ;;  %v170_v29 = vadd.s32 9, %v132_v48  ;;  %vm832_vm15 = vmand %vm152_vm10, %vm143_vm7 }
  0x27   :  { %vm191_vm8 = vcmp.eq.s32.totalorder %v789_v54, 5  ;;  %vm183_vm13 = vcmp.eq.s32.totalorder %v801_v60, 1  ;;  %vm192_vm14 = vcmp.eq.s32.totalorder %v801_v60, 5  ;;  %v829_v62 = vsel %vm159_vm6, %v168_v57, %v110_v17 }
  0x28   :  { %vm184_vm1 = vcmp.eq.s32.totalorder %v806_v61, 1  ;;  %vm193_vm2 = vcmp.eq.s32.totalorder %v806_v61, 5  ;;  %vm180_vm3 = vcmp.eq.s32.totalorder %v810_v63, 1  ;;  %vm189_vm4 = vcmp.eq.s32.totalorder %v810_v63, 5  ;;  %vm856_vm10 = vmor %vm182_vm11, %vm191_vm8 }
  0x29   :  { %v850_v34 = vsel %vm822_vm12, %v169_v11, %v121_v43  ;;  %v865_v42 = vsel %vm832_vm15, %v170_v29, %v132_v48  ;;  %vm872_vm11 = vmor %vm183_vm13, %vm192_vm14  ;;  %vm1306_vm5 = vcmp.lt.s32.totalorder %v681_v14, 126  ;;  %vm1309_vm7 = vcmp.eq.s32.totalorder %v815_v25, 5 }
  0x2a   :  { %331 = vrot.lane.b32.xlu1 %v633_v6, %s594_s0  ;;  %329 = vrot.lane.b32.xlu0 %v627_v4, %s594_s0  ;;  %vm892_vm13 = vmor %vm184_vm1, %vm193_vm2  ;;  %vm187_vm14 = vcmp.eq.s32.totalorder %v850_v34, 1  ;;  %vm196_vm6 = vcmp.eq.s32.totalorder %v850_v34, 5  ;;  %vm1310_vm8 = vcmp.eq.s32.totalorder %v815_v25, 1  ;;  %vm1314_vm9 = vcmp.eq.s32.totalorder %v819_v26, 1 }
  0x2b   :  { %vm906_vm1 = vmor %vm180_vm3, %vm189_vm4  ;;  %vm447_vm15 = vcmp.lt.s32.totalorder %v681_v14, 4 }
  0x2c   :  { %vm1307_vm3 = vmmov %vm1306_vm5 }
  0x2d   :  { %vm1308_vm4 = vmmov %vm1307_vm3 }
  0x2e   :  { %335 = vrot.lane.b32.xlu1 %v643_v8, %s594_s0  ;;  %333 = vrot.lane.b32.xlu0 %v639_v7, %s594_s0  ;;  %vm935_vm0 = vmor %vm1310_vm8, %vm1309_vm7  ;;  %vm1319_vm7 = vcmp.eq.s32.totalorder %v829_v62, 1 }
  0x2f   :  { %vm1322_vm12 = vmmov %vm1307_vm3 }
  0x32   :  { %376 = vrot.lane.b32.xlu1 %v631_v5, %s595_s12  ;;  %374 = vrot.lane.b32.xlu0 %v613_v1, %s595_s12 }
  0x36   :  { %380 = vrot.lane.b32.xlu1 %v619_v2, %s595_s12  ;;  %378 = vrot.lane.b32.xlu0 %v611_v0, %s595_s12 }
  0x3a   :  { %384 = vrot.lane.b32.xlu1 %v627_v4, %s595_s12  ;;  %382 = vrot.lane.b32.xlu0 %v621_v3, %s595_s12 }
  0x3e   :  { %388 = vrot.lane.b32.xlu1 %v639_v7, %s595_s12  ;;  %386 = vrot.lane.b32.xlu0 %v633_v6, %s595_s12 }
  0x42   :  { %429 = vrot.lane.b32.xlu1 %v613_v1, %s596_s13  ;;  %390 = vrot.lane.b32.xlu0 %v643_v8, %s595_s12 }
  0x46   :  { %433 = vrot.lane.b32.xlu1 %v611_v0, %s596_s13  ;;  %431 = vrot.lane.b32.xlu0 %v631_v5, %s596_s13 }
  0x4a   :  { %437 = vrot.lane.b32.xlu1 %v621_v3, %s596_s13  ;;  %435 = vrot.lane.b32.xlu0 %v619_v2, %s596_s13 }
  0x4e   :  { %441 = vrot.lane.b32.xlu1 %v633_v6, %s596_s13  ;;  %439 = vrot.lane.b32.xlu0 %v627_v4, %s596_s13 }
  0x52   :  { %445 = vrot.lane.b32.xlu1 %v643_v8, %s596_s13  ;;  %443 = vrot.lane.b32.xlu0 %v639_v7, %s596_s13 }
  0x80   :  { %v673_v9 = vpop.permute.xlu1 %268  ;;  %v675_v10 = vpop.permute.xlu0 %264 }
  0x84   :  { %v677_v12 = vpop.permute.xlu1 %270  ;;  %v679_v13 = vpop.permute.xlu0 %272 }
  0x85   :  { %v288_v30 = vsel %vm1306_vm5, %v673_v9, %v677_v12  ;;  %v923_v45 = vsel %vm1307_vm3, %v677_v12, %v679_v13  ;;  %vm225_vm5 = vcmp.eq.s32.totalorder %v810_v63, 7 }
  0x88   :  { %v683_v15 = vpop.permute.xlu1 %274  ;;  %v685_v16 = vpop.permute.xlu0 %266 }
  0x89   :  { %v929_v48 = vsel %vm1308_vm4, %v679_v13, %v683_v15  ;;  %v290_v12 = vsel %vm1307_vm3, %v675_v10, %v685_v16  ;;  %vm1313_vm4 = vcmp.eq.s32.totalorder %v819_v26, 5 }
  0x8a   :  { %vm949_vm2 = vmor %vm1314_vm9, %vm1313_vm4  ;;  %vm1318_vm4 = vcmp.eq.s32.totalorder %v829_v62, 5 }
  0x8b   :  { %vm1317_vm9 = vmmov %vm1307_vm3  ;;  %vm216_vm3 = vcmp.eq.s32.totalorder %v810_v63, 3 }
  0x8c   :  { %v695_v23 = vpop.permute.xlu1 %278  ;;  %v697_v24 = vpop.permute.xlu0 %276  ;;  %v289_v51 = vsel %vm1317_vm9, %v685_v16, %v673_v9  ;;  %vm970_vm8 = vmor %vm1319_vm7, %vm1318_vm4  ;;  %vm246_vm9 = vcmp.eq.s32.totalorder %v801_v60, 6  ;;  %v312_v9 = vsel %vm856_vm10, %v288_v30, %v611_v0  ;;  %v313_v16 = vsel %vm872_vm11, %v923_v45, %v619_v2 }
  0x8d   :  { %v285_v53 = vsel %vm1322_vm12, %v683_v15, %v697_v24  ;;  %v314_v15 = vsel %vm892_vm13, %v929_v48, %v621_v3  ;;  %v997_v40 = vsel %vm1322_vm12, %v697_v24, %v695_v23  ;;  %vm1003_vm10 = vmor %vm187_vm14, %vm196_vm6  ;;  %vm233_vm7 = vcmp.eq.s32.totalorder %v865_v42, 7 }
  0x8e   :  { %v310_v2 = vsel %vm906_vm1, %v290_v12, %v613_v1  ;;  %vm1325_vm13 = vcmp.eq.s32.totalorder %v865_v42, 5  ;;  %vm1326_vm4 = vcmp.eq.s32.totalorder %v865_v42, 1  ;;  %vm1329_vm6 = vcmp.lt.s32.totalorder %v681_v14, 126 }
  0x8f   :  { %vm1016_vm12 = vmor %vm1326_vm4, %vm1325_vm13  ;;  %vm1331_vm1 = vcmp.lt.s32.totalorder %v681_v14, 124  ;;  %v315_v11 = vsel %vm949_vm2, %v285_v53, %v627_v4  ;;  %vm1351_vm11 = vcmp.eq.s32.totalorder %v815_v25, 3  ;;  %vm1355_vm13 = vcmp.eq.s32.totalorder %v806_v61, 2 }
  0x90   :  { %v713_v35 = vpop.permute.xlu1 %319  ;;  %v716_v37 = vpop.permute.xlu0 %280  ;;  %vm1330_vm14 = vmmov %vm1329_vm6 }
  0x91   :  { %v1024_v24 = vsel %vm1329_vm6, %v695_v23, %v716_v37  ;;  %v291_v57 = vsel %vm1330_vm14, %v716_v37, %v675_v10  ;;  %v311_v23 = vsel %vm935_vm0, %v289_v51, %v631_v5  ;;  %vm1332_vm6 = vmmov %vm1331_vm1  ;;  %v316_v5 = vsel %vm970_vm8, %v997_v40, %v633_v6 }
  0x92   :  { %vm1333_vm14 = vmmov %vm1331_vm1  ;;  %vm1340_vm8 = vcmp.lt.s32.totalorder %v681_v14, 2 }
  0x93   :  { %vm1334_vm0 = vmmov %vm1331_vm1 }
  0x94   :  { %v731_v46 = vpop.permute.xlu1 %323  ;;  %v733_v47 = vpop.permute.xlu0 %321  ;;  %vm1335_vm2 = vmmov %vm1334_vm0 }
  0x95   :  { %v345_v1 = vsel %vm1331_vm1, %v713_v35, %v733_v47  ;;  %v344_v10 = vsel %vm1332_vm6, %v733_v47, %v731_v46  ;;  %vm1336_vm6 = vcmp.eq.s32.totalorder %v789_v54, 7 }
  0x98   :  { %v743_v55 = vpop.permute.xlu1 %327  ;;  %v745_v56 = vpop.permute.xlu0 %325 }
  0x99   :  { %v343_v37 = vsel %vm1333_vm14, %v731_v46, %v745_v56  ;;  %v342_v4 = vsel %vm1334_vm0, %v745_v56, %v743_v55  ;;  %vm1337_vm14 = vcmp.eq.s32.totalorder %v789_v54, 3  ;;  %v317_v56 = vsel %vm1003_vm10, %v1024_v24, %v639_v7  ;;  %vm1346_vm10 = vmmov %vm1340_vm8 }
  0x9a   :  { %vm1068_vm1 = vmor %vm1337_vm14, %vm1336_vm6  ;;  %vm1341_vm0 = vcmp.eq.s32.totalorder %v810_v63, 2  ;;  %vm1343_vm6 = vcmp.eq.s32.totalorder %v801_v60, 3 }
  0x9b   :  { %v1085_v31 = vsel %vm1341_vm0, %v345_v1, %v310_v2  ;;  %vm1348_vm0 = vcmp.eq.s32.totalorder %v789_v54, 2 }
  0x9c   :  { %v751_v21 = vpop.permute.xlu1 %331  ;;  %v753_v22 = vpop.permute.xlu0 %329  ;;  %v367_v17 = vsel %vm1348_vm0, %v343_v37, %v312_v9  ;;  %vm1358_vm0 = vcmp.eq.s32.totalorder %v806_v61, 3 }
  0x9d   :  { %v341_v47 = vsel %vm1335_vm2, %v743_v55, %v753_v22  ;;  %v318_v55 = vsel %vm1016_vm12, %v291_v57, %v643_v8  ;;  %vm1342_vm2 = vcmp.eq.s32.totalorder %v801_v60, 7  ;;  %vm1347_vm12 = vcmp.eq.s32.totalorder %v815_v25, 2 }
  0x9e   :  { %vm1091_vm14 = vmor %vm1343_vm6, %vm1342_vm2  ;;  %v366_v8 = vsel %vm1347_vm12, %v344_v10, %v311_v23  ;;  %vm1349_vm2 = vcmp.lt.s32.totalorder %v681_v14, 124  ;;  %vm1350_vm6 = vcmp.eq.s32.totalorder %v815_v25, 7  ;;  %v369_v30 = vsel %vm1355_vm13, %v341_v47, %v314_v15 }
  0x9f   :  { %v340_v20 = vsel %vm1349_vm2, %v753_v22, %v751_v21  ;;  %vm1112_vm4 = vmor %vm1351_vm11, %vm1350_vm6  ;;  %vm1354_vm2 = vcmp.eq.s32.totalorder %v801_v60, 2  ;;  %vm1356_vm11 = vcmp.lt.s32.totalorder %v681_v14, 124  ;;  %vm1357_vm6 = vcmp.eq.s32.totalorder %v806_v61, 7 }
  0xa0   :  { %v756_v38 = vpop.permute.xlu1 %335  ;;  %v758_v39 = vpop.permute.xlu0 %333  ;;  %v368_v22 = vsel %vm1354_vm2, %v342_v4, %v313_v16  ;;  %vm1136_vm12 = vmor %vm1358_vm0, %vm1357_vm6  ;;  %vm1361_vm13 = vcmp.eq.s32.totalorder %v819_v26, 7  ;;  %vm1362_vm2 = vcmp.eq.s32.totalorder %v819_v26, 3  ;;  %vm1368_vm6 = vcmp.lt.s32.totalorder %v681_v14, 124 }
  0xa1   :  { %v346_v45 = vsel %vm1356_vm11, %v756_v38, %v713_v35  ;;  %vm1146_vm11 = vmor %vm1362_vm2, %vm1361_vm13  ;;  %v338_v15 = vsel %vm1368_vm6, %v758_v39, %v756_v38  ;;  %vm1369_vm13 = vcmp.eq.s32.totalorder %v829_v62, 7  ;;  %vm1370_vm2 = vcmp.eq.s32.totalorder %v829_v62, 3 }
  0xa2   :  { %v339_v38 = vsel %vm1368_vm6, %v751_v21, %v758_v39  ;;  %vm1389_vm6 = vcmp.eq.s32.totalorder %v829_v62, 2 }
  0xa4   :  { %v768_v44 = vpop.permute.xlu1 %376  ;;  %v770_v27 = vpop.permute.xlu0 %374 }
  0xa8   :  { %v795_v58 = vpop.permute.xlu1 %380  ;;  %v797_v59 = vpop.permute.xlu0 %378 }
  0xa9   :  { %v399_v6 = vsel %vm1340_vm8, %v768_v44, %v797_v59  ;;  %v398_v7 = vsel %vm1346_vm10, %v797_v59, %v795_v58  ;;  %vm249_vm10 = vcmp.eq.s32.totalorder %v829_v62, 6 }
  0xaa   :  { %v422_v48 = vsel %vm1068_vm1, %v399_v6, %v367_v17  ;;  %v423_v51 = vsel %vm1091_vm14, %v398_v7, %v368_v22  ;;  %vm1365_vm1 = vmmov %vm1340_vm8  ;;  %vm1367_vm14 = vcmp.eq.s32.totalorder %v819_v26, 2  ;;  %vm1375_vm8 = vcmp.eq.s32.totalorder %v850_v34, 7 }
  0xab   :  { %vm1366_vm0 = vmmov %vm1365_vm1  ;;  %v370_v16 = vsel %vm1367_vm14, %v340_v20, %v315_v11  ;;  %vm1374_vm14 = vcmp.eq.s32.totalorder %v865_v42, 2 }
  0xac   :  { %v837_v32 = vpop.permute.xlu1 %384  ;;  %v839_v33 = vpop.permute.xlu0 %382  ;;  %v373_v0 = vsel %vm1374_vm14, %v346_v45, %v318_v55 }
  0xad   :  { %v396_v52 = vsel %vm1365_vm1, %v839_v33, %v837_v32  ;;  %v397_v53 = vsel %vm1366_vm0, %v795_v58, %v839_v33  ;;  %vm1170_vm1 = vmor %vm1370_vm2, %vm1369_vm13  ;;  %vm1373_vm0 = vcmp.eq.s32.totalorder %v789_v54, 6  ;;  %vm1376_vm13 = vcmp.eq.s32.totalorder %v850_v34, 3 }
  0xae   :  { %vm1188_vm2 = vmor %vm1376_vm13, %vm1375_vm8  ;;  %v424_v21 = vsel %vm1136_vm12, %v397_v53, %v369_v30  ;;  %v425_v39 = vsel %vm1146_vm11, %v396_v52, %v370_v16  ;;  %vm1384_vm11 = vcmp.eq.s32.totalorder %v865_v42, 3  ;;  %vm1391_vm13 = vcmp.eq.s32.totalorder %v819_v26, 6 }
  0xaf   :  { %vm1222_vm14 = vmor %vm1384_vm11, %vm233_vm7  ;;  %vm1390_vm7 = vcmp.eq.s32.totalorder %v806_v61, 6 }
  0xb0   :  { %v884_v18 = vpop.permute.xlu1 %388  ;;  %v886_v19 = vpop.permute.xlu0 %386 }
  0xb4   :  { %v957_v50 = vpop.permute.xlu1 %429  ;;  %v959_v36 = vpop.permute.xlu0 %390 }
  0xb8   :  { %v434_v28 = vpop.permute.xlu1 %433  ;;  %v432_v29 = vpop.permute.xlu0 %431 }
  0xb9   :  { %v454_v59 = vsel %vm447_vm15, %v432_v29, %v434_v28 }
  0xba   :  { %v477_v58 = vsel %vm1373_vm0, %v454_v59, %v422_v48  ;;  %vm1210_vm0 = vmor %vm216_vm3, %vm225_vm5 }
  0xbc   :  { %v438_v12 = vpop.permute.xlu1 %437  ;;  %v436_v13 = vpop.permute.xlu0 %435 }
  0xbd   :  { %v453_v9 = vsel %vm447_vm15, %v434_v28, %v436_v13  ;;  %v452_v54 = vsel %vm447_vm15, %v436_v13, %v438_v12  ;;  %v455_v28 = vsel %vm447_vm15, %v957_v50, %v432_v29 }
  0xbe   :  { %v478_v33 = vsel %vm246_vm9, %v453_v9, %v423_v51  ;;  %vm1379_vm9 = vcmp.lt.s32.totalorder %v681_v14, 2  ;;  %v479_v4 = vsel %vm1390_vm7, %v452_v54, %v424_v21 }
  0xbf   :  { %v493_v60 = vcombine.low %v477_v58, %v478_v33  ;;  %v400_v3 = vsel %vm1379_vm9, %v770_v27, %v768_v44  ;;  %vm1380_vm8 = vmmov %vm1379_vm9  ;;  %vm1392_vm9 = vcmp.eq.s32.totalorder %v850_v34, 2 }
  0xc0   :  { %v394_v24 = vsel %vm1380_vm8, %v886_v19, %v884_v18  ;;  %v442_v44 = vpop.permute.xlu1 %441  ;;  %v440_v1 = vpop.permute.xlu0 %439  ;;  %vm1383_vm12 = vmmov %vm1380_vm8 }
  0xc1   :  { %v395_v23 = vsel %vm1383_vm12, %v837_v32, %v886_v19  ;;  %vm1387_vm5 = vmmov %vm1380_vm8  ;;  %501 = vst [vmem:[#allocation5 + $0x8] sm:$0xff] %v493_v60  ;;  %v451_v32 = vsel %vm447_vm15, %v438_v12, %v440_v1  ;;  %v371_v19 = vsel %vm1389_vm6, %v339_v38, %v316_v5  ;;  %v450_v47 = vsel %vm447_vm15, %v440_v1, %v442_v44 }
  0xc2   :  { %v393_v10 = vsel %vm1387_vm5, %v884_v18, %v959_v36  ;;  %vm1388_vm3 = vmmov %vm1387_vm5  ;;  %v480_v18 = vsel %vm1391_vm13, %v451_v32, %v425_v39  ;;  %v426_v46 = vsel %vm1170_vm1, %v395_v23, %v371_v19  ;;  %vm1394_vm1 = vcmp.eq.s32.totalorder %v810_v63, 6 }
  0xc3   :  { %v401_v37 = vsel %vm1388_vm3, %v959_v36, %v770_v27  ;;  %v372_v27 = vsel %vm1392_vm9, %v338_v15, %v317_v56  ;;  %v421_v36 = vsel %vm1112_vm4, %v400_v3, %v366_v8  ;;  %v494_v5 = vcombine.low %v479_v4, %v480_v18 }
  0xc4   :  { %v427_v61 = vsel %vm1188_vm2, %v394_v24, %v372_v27  ;;  %v420_v26 = vsel %vm1210_vm0, %v401_v37, %v1085_v31  ;;  %v428_v29 = vsel %vm1222_vm14, %v393_v10, %v373_v0  ;;  %v446_v6 = vpop.permute.xlu1 %445  ;;  %v444_v56 = vpop.permute.xlu0 %443  ;;  %vm1393_vm4 = vcmp.eq.s32.totalorder %v815_v25, 6 }
  0xc5   :  { %v476_v55 = vsel %vm1393_vm4, %v455_v28, %v421_v36  ;;  %502 = vst [vmem:[#allocation5 + $0x10] sm:$0xff] %v494_v5  ;;  %v456_v41 = vsel %vm447_vm15, %v446_v6, %v957_v50  ;;  %v448_v7 = vsel %vm447_vm15, %v444_v56, %v446_v6  ;;  %v449_v31 = vsel %vm447_vm15, %v442_v44, %v444_v56 }
  0xc6   :  { %v481_v8 = vsel %vm249_vm10, %v450_v47, %v426_v46  ;;  %v475_v17 = vsel %vm1394_vm1, %v456_v41, %v420_v26  ;;  %vm1395_vm2 = vcmp.eq.s32.totalorder %v850_v34, 6  ;;  %vm1396_vm8 = vcmp.eq.s32.totalorder %v865_v42, 6 }
  0xc7   :  { %v482_v25 = vsel %vm1395_vm2, %v449_v31, %v427_v61  ;;  %v483_v20 = vsel %vm1396_vm8, %v448_v7, %v428_v29  ;;  %v492_v43 = vcombine.low %v475_v17, %v476_v55 }
  0xc8   :  { %v495_v50 = vcombine.low %v481_v8, %v482_v25  ;;  %504 = vst [vmem:[#allocation5 + $0x20] sm:$0xf] %v483_v20 }
  0xc9   :  { %500 = vst [vmem:[#allocation5] sm:$0xff] %v492_v43 }
  0xca   :  { %503 = vst [vmem:[#allocation5 + $0x18] sm:$0xff] %v495_v50 }
  0xcb   :  { %579 = shalt.err (!%p576_p9)
}
  0xcc   :  { %514 = dma.vmem_to_hbm [thread:$0]  %s512_s15, 576, %s1281_s1, [#allocation4]  }
  0xcd   :  { %590 = dma.done.wait [#allocation4], 576  }
  0xce   :  { %591 = vsyncadd [#allocation4], 4294966720 }
  0xcf   :  { %518 = vsyncpa [#allocation3], 1 }
  0xd0   :  { %519 = vsyncpa [#allocation4], 1 }

</bundles_post_ra>
